<compile_context>
chip_gen: v7x
topology: tpu7x:2x2x1
jax: 0.10.0
libtpu: 0.0.40
codegen_flags: <defaults>
</compile_context>

<pallas_src>
import functools

import jax
import jax.numpy as jnp
import numpy as np
from jax.experimental import pallas as pl
from jax.experimental.pallas import tpu as pltpu


def controller_kernel(x_ref, w1_ref, b1_ref, w2_ref, b2_ref, w3t_ref, b3_ref,
                      act_ref, *, action_dims):
    """MLP (bf16 MXU / f32 accumulate) + argmax (+ fused MultiDiscrete decode)."""
    # Layer 1 / 2: MXU takes bf16 operands, bias + ReLU in f32 on the VPU.
    h = jnp.dot(x_ref[...], w1_ref[...], preferred_element_type=jnp.float32)
    h = jnp.maximum(h + b1_ref[...], 0.0)
    h = jnp.dot(h.astype(jnp.bfloat16), w2_ref[...],
                preferred_element_type=jnp.float32)
    h = jnp.maximum(h + b2_ref[...], 0.0)

    # Layer 3, transposed: q_t[a, b] = sum_k W3[a, k] * h[b, k]  -> (A, TILE_B)
    # so Q-values come out with the batch on the lane axis (lane-dense output).
    q_t = jax.lax.dot_general(
        w3t_ref[...], h.astype(jnp.bfloat16),
        dimension_numbers=(((1,), (1,)), ((), ())),
        preferred_element_type=jnp.float32)
    q_t = q_t + b3_ref[...]

    # argmax over the action (sublane) axis; first index wins ties, like
    # torch.argmax. Result is already lane-dense: (1, TILE_B) int32.
    n_act = q_t.shape[0]
    q_max = jnp.max(q_t, axis=0, keepdims=True)
    ridx = jax.lax.broadcasted_iota(jnp.int32, q_t.shape, 0)
    cand = jnp.where(q_t == q_max, ridx, jnp.int32(n_act))
    flat = jnp.min(cand, axis=0, keepdims=True)          # (1, TILE_B) int32

    if action_dims is None:
        act_ref[...] = flat
        return

    # Fused MultiDiscrete decode: row j = actions % d_j ; actions //= d_j.
    # The VPU has no vector integer divide, so use an exact f32 divide with a
    # one-step correction (exact for realistic action-head sizes).
    a = flat
    for j, d in enumerate(action_dims):
        q = jnp.floor(a.astype(jnp.float32) / jnp.float32(d)).astype(jnp.int32)
        q = jnp.where(q * d > a, q - 1, q)
        q = jnp.where((q + 1) * d <= a, q + 1, q)
        act_ref[j:j + 1, :] = a - q * d
        a = q


@functools.partial(jax.jit, static_argnames=("action_dims", "tile_b"))
def _controller_forward_jit(x, params, action_dims, tile_b):
    w1, b1, w2, b2, w3t, b3 = params
    batch, obs_dim = x.shape
    hidden = w1.shape[1]
    n_act = w3t.shape[0]
    n_rows = 1 if action_dims is None else len(action_dims)

    # Pad batch to a multiple of the tile so each MXU pass is well filled.
    b_pad = tile_b * pl.cdiv(batch, tile_b)
    xb = x.astype(jnp.bfloat16)
    if b_pad != batch:
        xb = jnp.pad(xb, ((0, b_pad - batch), (0, 0)))

    # Weights/biases: constant index_maps -> stay resident in VMEM across steps.
    def const(shape):
        return pl.BlockSpec(shape, lambda i: (0, 0))

    out = pl.pallas_call(
        functools.partial(controller_kernel, action_dims=action_dims),
        out_shape=jax.ShapeDtypeStruct((n_rows, b_pad), jnp.int32),
        grid=(b_pad // tile_b,),
        in_specs=[
            pl.BlockSpec((tile_b, obs_dim), lambda i: (i, 0)),  # x: batch-tiled
            const((obs_dim, hidden)),   # w1 (bf16, resident)
            const((1, hidden)),         # b1 (f32)
            const((hidden, hidden)),    # w2 (bf16, resident)
            const((1, hidden)),         # b2 (f32)
            const((n_act, hidden)),     # w3 in PyTorch (out, in) layout (bf16)
            const((n_act, 1)),          # b3 (f32 column)
        ],
        out_specs=pl.BlockSpec((n_rows, tile_b), lambda i: (0, i)),  # lane-dense
        compiler_params=pltpu.CompilerParams(
            dimension_semantics=("parallel",)),   # 2x on v7x dual-TC
    )(xb, w1, b1, w2, b2, w3t, b3)

    out = out[:, :batch]
    return out[0] if action_dims is None else out.T


def controller_forward(x, params, action_dims=None, tile_b=128):
    """Mirrors Controller.forward.

    Discrete:       returns (B,) int32 flat actions.
    MultiDiscrete:  pass action_dims (sequence of ints); returns
                    (B, len(action_dims)) int32, decoded inside the kernel.
    tile_b: batch rows per grid step / MXU pass. 128 minimum; use 256-512 on
            v6e/v7x for large batches (VMEM is not a constraint here).
    """
    if action_dims is not None:
        action_dims = tuple(int(d) for d in action_dims)
    return _controller_forward_jit(x, tuple(params), action_dims, int(tile_b))


def init_params(key, obs_dim, hidden, action_dim):
    """PyTorch-style U(-1/sqrt(fan_in), +bound) init, stored in kernel layout:
    w1, w2 as (in, out) bf16; w3 kept in PyTorch (out, in) layout bf16 so the
    kernel's last matmul emits Q-values batch-on-lanes; biases stay f32."""
    ks = jax.random.split(key, 6)

    def lin(kw, kb, fan_in, fan_out):
        bound = 1.0 / np.sqrt(fan_in)
        w = jax.random.uniform(kw, (fan_in, fan_out), jnp.float32, -bound, bound)
        b = jax.random.uniform(kb, (fan_out,), jnp.float32, -bound, bound)
        return w, b

    w1, b1 = lin(ks[0], ks[1], obs_dim, hidden)
    w2, b2 = lin(ks[2], ks[3], hidden, hidden)
    w3, b3 = lin(ks[4], ks[5], hidden, action_dim)
    return (w1.astype(jnp.bfloat16), b1.reshape(1, hidden),
            w2.astype(jnp.bfloat16), b2.reshape(1, hidden),
            w3.T.astype(jnp.bfloat16), b3.reshape(action_dim, 1))


def reference_forward(x, params, action_dims=None):
    """Pure-JAX reference using the same bf16-operand / f32-accumulate math."""
    w1, b1, w2, b2, w3t, b3 = params
    h = jnp.maximum(jnp.dot(x.astype(jnp.bfloat16), w1,
                            preferred_element_type=jnp.float32) + b1, 0.0)
    h = jnp.maximum(jnp.dot(h.astype(jnp.bfloat16), w2,
                            preferred_element_type=jnp.float32) + b2, 0.0)
    q_t = jax.lax.dot_general(w3t, h.astype(jnp.bfloat16),
                              (((1,), (1,)), ((), ())),
                              preferred_element_type=jnp.float32) + b3
    actions = jnp.argmax(q_t, axis=0).astype(jnp.int32)
    if action_dims is None:
        return actions
    cols = []
    for d in action_dims:
        cols.append(actions % d)
        actions = actions // d
    return jnp.stack(cols, axis=-1).astype(jnp.int32)


if __name__ == "__main__":
    # Small shapes consistent with the module: flat obs -> MLP(128) -> argmax.
    B, OBS_DIM, HIDDEN = 8, 16, 128
    ACTION_DIM = 6                    # Discrete(6)
    MULTI_DIMS = (3, 2)               # MultiDiscrete([3, 2]) -> prod = 6 q-values

    key = jax.random.PRNGKey(0)
    k_x, k_p = jax.random.split(key)
    x = jax.random.normal(k_x, (B, OBS_DIM), jnp.float32)
    params = init_params(k_p, OBS_DIM, HIDDEN, ACTION_DIM)

    # Discrete action space
    actions = jax.block_until_ready(controller_forward(x, params))
    ref = reference_forward(x, params)
    assert actions.shape == (B,) and actions.dtype == jnp.int32
    assert jnp.array_equal(actions, ref), (actions, ref)

    # MultiDiscrete action space (same q-head, decode fused inside the kernel)
    actions_md = jax.block_until_ready(
        controller_forward(x, params, action_dims=MULTI_DIMS))
    ref_md = reference_forward(x, params, action_dims=MULTI_DIMS)
    assert actions_md.shape == (B, len(MULTI_DIMS))
    assert jnp.array_equal(actions_md, ref_md), (actions_md, ref_md)

    print("KERNEL_OK")
</pallas_src>

<mosaic_0001>
module attributes {stable_mosaic.version = 11 : i64} {
  func.func @controller_kernel(%arg0: i32, %arg1: memref<128x16xbf16, #tpu.memory_space<vmem>>, %arg2: memref<16x128xbf16, #tpu.memory_space<vmem>>, %arg3: memref<1x128xf32, #tpu.memory_space<vmem>>, %arg4: memref<128x128xbf16, #tpu.memory_space<vmem>>, %arg5: memref<1x128xf32, #tpu.memory_space<vmem>>, %arg6: memref<6x128xbf16, #tpu.memory_space<vmem>>, %arg7: memref<6x1xf32, #tpu.memory_space<vmem>>, %arg8: memref<1x128xi32, #tpu.memory_space<vmem>>) attributes {dimension_semantics = [#tpu.dimension_semantics<parallel>], iteration_bounds = array<i64: 1>, scalar_prefetch = 0 : i64, scratch_operands = 0 : i64, tpu.core_type = #tpu.core_type<tc>, window_params = [{transform_indices = @transform_0, window_bounds = array<i64: 128, 16>}, {pipeline_mode = #tpu.pipeline_mode<synchronous>, transform_indices = @transform_1, window_bounds = array<i64: 16, 128>}, {pipeline_mode = #tpu.pipeline_mode<synchronous>, transform_indices = @transform_2, window_bounds = array<i64: 1, 128>}, {pipeline_mode = #tpu.pipeline_mode<synchronous>, transform_indices = @transform_3, window_bounds = array<i64: 128, 128>}, {pipeline_mode = #tpu.pipeline_mode<synchronous>, transform_indices = @transform_4, window_bounds = array<i64: 1, 128>}, {pipeline_mode = #tpu.pipeline_mode<synchronous>, transform_indices = @transform_5, window_bounds = array<i64: 6, 128>}, {pipeline_mode = #tpu.pipeline_mode<synchronous>, transform_indices = @transform_6, window_bounds = array<i64: 6, 1>}, {transform_indices = @transform_7, window_bounds = array<i64: 1, 128>}]} {
    %c0 = arith.constant 0 : index
    %c0_0 = arith.constant 0 : index
    %0 = vector.load %arg1[%c0, %c0_0] : memref<128x16xbf16, #tpu.memory_space<vmem>>, vector<128x16xbf16>
    %c0_1 = arith.constant 0 : index
    %c0_2 = arith.constant 0 : index
    %1 = vector.load %arg2[%c0_1, %c0_2] : memref<16x128xbf16, #tpu.memory_space<vmem>>, vector<16x128xbf16>
    %cst = arith.constant dense<0.000000e+00> : vector<128x128xf32>
    %2 = tpu.matmul %0, %1, %cst {dimension_numbers = #tpu.dot_dimension_numbers<[1], [0], [0], [1], [0, 0, 1, 1], [], []>} : vector<128x16xbf16>, vector<16x128xbf16>, vector<128x128xf32> -> vector<128x128xf32>
    %c0_3 = arith.constant 0 : index
    %c0_4 = arith.constant 0 : index
    %3 = vector.load %arg3[%c0_3, %c0_4] : memref<1x128xf32, #tpu.memory_space<vmem>>, vector<1x128xf32>
    %4 = vector.broadcast %3 : vector<1x128xf32> to vector<128x128xf32>
    %5 = arith.addf %2, %4 : vector<128x128xf32>
    %cst_5 = arith.constant 0.000000e+00 : f32
    %6 = vector.broadcast %cst_5 : f32 to vector<128x128xf32>
    %7 = arith.maximumf %5, %6 : vector<128x128xf32>
    %8 = arith.truncf %7 : vector<128x128xf32> to vector<128x128xbf16>
    %c0_6 = arith.constant 0 : index
    %c0_7 = arith.constant 0 : index
    %9 = vector.load %arg4[%c0_6, %c0_7] : memref<128x128xbf16, #tpu.memory_space<vmem>>, vector<128x128xbf16>
    %cst_8 = arith.constant dense<0.000000e+00> : vector<128x128xf32>
    %10 = tpu.matmul %8, %9, %cst_8 {dimension_numbers = #tpu.dot_dimension_numbers<[1], [0], [0], [1], [0, 0, 1, 1], [], []>} : vector<128x128xbf16>, vector<128x128xbf16>, vector<128x128xf32> -> vector<128x128xf32>
    %c0_9 = arith.constant 0 : index
    %c0_10 = arith.constant 0 : index
    %11 = vector.load %arg5[%c0_9, %c0_10] : memref<1x128xf32, #tpu.memory_space<vmem>>, vector<1x128xf32>
    %12 = vector.broadcast %11 : vector<1x128xf32> to vector<128x128xf32>
    %13 = arith.addf %10, %12 : vector<128x128xf32>
    %cst_11 = arith.constant 0.000000e+00 : f32
    %14 = vector.broadcast %cst_11 : f32 to vector<128x128xf32>
    %15 = arith.maximumf %13, %14 : vector<128x128xf32>
    %c0_12 = arith.constant 0 : index
    %c0_13 = arith.constant 0 : index
    %16 = vector.load %arg6[%c0_12, %c0_13] : memref<6x128xbf16, #tpu.memory_space<vmem>>, vector<6x128xbf16>
    %17 = arith.truncf %15 : vector<128x128xf32> to vector<128x128xbf16>
    %cst_14 = arith.constant dense<0.000000e+00> : vector<6x128xf32>
    %18 = tpu.matmul %16, %17, %cst_14 {dimension_numbers = #tpu.dot_dimension_numbers<[1], [1], [0], [0], [0, 0, 1, 0], [], []>} : vector<6x128xbf16>, vector<128x128xbf16>, vector<6x128xf32> -> vector<6x128xf32>
    %c0_15 = arith.constant 0 : index
    %c0_16 = arith.constant 0 : index
    %19 = vector.load %arg7[%c0_15, %c0_16] : memref<6x1xf32, #tpu.memory_space<vmem>>, vector<6x1xf32>
    %20 = vector.broadcast %19 : vector<6x1xf32> to vector<6x128xf32>
    %21 = arith.addf %18, %20 : vector<6x128xf32>
    %cst_17 = arith.constant dense<0xFF800000> : vector<128xf32>
    %22 = vector.multi_reduction <maximumf>, %21, %cst_17 [0] : vector<6x128xf32> to vector<128xf32>
    %23 = vector.shape_cast %22 : vector<128xf32> to vector<1x128xf32>
    %24 = tpu.iota {dimensions = array<i32: 0>} : vector<6x128xi32>
    %25 = vector.broadcast %23 : vector<1x128xf32> to vector<6x128xf32>
    %26 = arith.cmpf oeq, %21, %25 : vector<6x128xf32>
    %c6_i32 = arith.constant 6 : i32
    %27 = vector.broadcast %c6_i32 : i32 to vector<6x128xi32>
    %28 = arith.select %26, %24, %27 : vector<6x128xi1>, vector<6x128xi32>
    %cst_18 = arith.constant dense<2147483647> : vector<128xi32>
    %29 = vector.multi_reduction <minsi>, %28, %cst_18 [0] : vector<6x128xi32> to vector<128xi32>
    %30 = vector.shape_cast %29 : vector<128xi32> to vector<1x128xi32>
    %c0_19 = arith.constant 0 : index
    %c0_20 = arith.constant 0 : index
    %31 = vector.load %arg8[%c0_19, %c0_20] : memref<1x128xi32, #tpu.memory_space<vmem>>, vector<1x128xi32>
    tpu.vector_store %arg8[%c0_19, %c0_20], %30 {strides = array<i32>} : memref<1x128xi32, #tpu.memory_space<vmem>>, vector<1x128xi32>,
    return
  }
  func.func @transform_0(%arg0: i32) -> (i32, i32) {
    %c0_i32 = arith.constant 0 : i32
    %c0_i32_0 = arith.constant 0 : i32
    return %arg0, %c0_i32 : i32, i32
  }
  func.func @transform_1(%arg0: i32) -> (i32, i32) {
    %c0_i32 = arith.constant 0 : i32
    %c0_i32_0 = arith.constant 0 : i32
    %c0_i32_1 = arith.constant 0 : i32
    return %c0_i32, %c0_i32_0 : i32, i32
  }
  func.func @transform_2(%arg0: i32) -> (i32, i32) {
    %c0_i32 = arith.constant 0 : i32
    %c0_i32_0 = arith.constant 0 : i32
    %c0_i32_1 = arith.constant 0 : i32
    return %c0_i32, %c0_i32_0 : i32, i32
  }
  func.func @transform_3(%arg0: i32) -> (i32, i32) {
    %c0_i32 = arith.constant 0 : i32
    %c0_i32_0 = arith.constant 0 : i32
    %c0_i32_1 = arith.constant 0 : i32
    return %c0_i32, %c0_i32_0 : i32, i32
  }
  func.func @transform_4(%arg0: i32) -> (i32, i32) {
    %c0_i32 = arith.constant 0 : i32
    %c0_i32_0 = arith.constant 0 : i32
    %c0_i32_1 = arith.constant 0 : i32
    return %c0_i32, %c0_i32_0 : i32, i32
  }
  func.func @transform_5(%arg0: i32) -> (i32, i32) {
    %c0_i32 = arith.constant 0 : i32
    %c0_i32_0 = arith.constant 0 : i32
    %c0_i32_1 = arith.constant 0 : i32
    return %c0_i32, %c0_i32_0 : i32, i32
  }
  func.func @transform_6(%arg0: i32) -> (i32, i32) {
    %c0_i32 = arith.constant 0 : i32
    %c0_i32_0 = arith.constant 0 : i32
    %c0_i32_1 = arith.constant 0 : i32
    return %c0_i32, %c0_i32_0 : i32, i32
  }
  func.func @transform_7(%arg0: i32) -> (i32, i32) {
    %c0_i32 = arith.constant 0 : i32
    %c0_i32_0 = arith.constant 0 : i32
    return %c0_i32, %arg0 : i32, i32
  }
}

</mosaic_0001>

<bundles_post_ra>
// kernel: _controller_forward_jit.1
= control target key start
LH: loop header
LB: loop body
LE: loop exit
PB: predicated region body
PF: predicated region fallthrough
CT: control target
= control target key end

     0   :  { %vm98_vm0 = vcmask 130048   ;;  %vm663_vm1 = vmmov 0   ;;  %vm483_vm2 = vcmask 1045504   ;;  %s790_s1 = inlined_call_operand.vmem [shape: bf16[16,128], index: 1, kind: input, shape index: {}]   ;;  %s791_s0 = inlined_call_operand.vmem [shape: bf16[128,16], index: 0, kind: input, shape index: {}]   ;;  %s792_s3 = inlined_call_operand.vmem [shape: bf16[128,128], index: 3, kind: input, shape index: {}]   ;;  %s793_s2 = inlined_call_operand.vmem [shape: f32[1,128], index: 2, kind: input, shape index: {}]   ;;  %s794_s6 = inlined_call_operand.vmem [shape: f32[6,1], index: 6, kind: input, shape index: {}]   ;;  %s795_s4 = inlined_call_operand.vmem [shape: f32[1,128], index: 4, kind: input, shape index: {}]   ;;  %s796_s5 = inlined_call_operand.vmem [shape: bf16[6,128], index: 5, kind: input, shape index: {}]   ;;  %s797_s7 = inlined_call_operand.vmem [shape: s32[1,128], index: 7, kind: output, shape index: {}]  }
   0x1   :  { %v645_v0 = vld [vmem:[%s790_s1] sm:$0xff]   ;;  %v647_v2 = vld [vmem:[%s791_s0 + $0x8] sm:$0xff]   ;;  %v648_v3 = vld [vmem:[%s791_s0 + $0x10] sm:$0xff]  }
   0x2   :  { %v646_v1 = vld [vmem:[%s791_s0] sm:$0xff]   ;;  %571 = vmatprep.subr.bf16.mxu1 %v645_v0  ;;  %v649_v4 = vld [vmem:[%s791_s0 + $0x18] sm:$0xff]   ;;  %v655_v6 = vld [vmem:[%s792_s3 + $0x8] sm:$0xff]  }
   0x3   :  { %572 = vmatpush3.bf16.msra.mxu1 %v645_v0  ;;  %573 = vmatprep.mubr.msk.bf16.mxu1 %vm98_vm0, %v646_v1  ;;  %v654_v5 = vld [vmem:[%s792_s3] sm:$0xff]   ;;  %v656_v8 = vld [vmem:[%s792_s3 + $0x10] sm:$0xff]   ;;  %v657_v9 = vld [vmem:[%s792_s3 + $0x18] sm:$0xff]  }
   0x4   :  { %v650_v7 = vld [vmem:[%s791_s0 + $0x20] sm:$0xff]   ;;  %589 = vmatprep.subr.bf16.mxu1 %v654_v5  ;;  %v651_v10 = vld [vmem:[%s791_s0 + $0x28] sm:$0xff]   ;;  %v652_v11 = vld [vmem:[%s791_s0 + $0x30] sm:$0xff]  }
   0x5   :  { %v658_v12 = vld [vmem:[%s792_s3 + $0x20] sm:$0xff]   ;;  %v659_v13 = vld [vmem:[%s792_s3 + $0x28] sm:$0xff]   ;;  %v653_v14 = vld [vmem:[%s791_s0 + $0x38] sm:$0xff]  }
   0x6   :  { %574 = vmatmul.mubr.msk.bf16.vlgmr.msra.gmra.mrb[0].mxu1 %vm98_vm0, %v647_v2  ;;  %v660_v15 = vld [vmem:[%s792_s3 + $0x30] sm:$0xff]   ;;  %v661_v16 = vld [vmem:[%s792_s3 + $0x38] sm:$0xff]   ;;  %v510_v17 = vld [vmem:[%s793_s2] ss:$0 sm:$0xff] }
   0x7   :  { %577 = vmatprep.mubr.msk.bf16.mxu1 %vm98_vm0, %v648_v3  ;;  %590 = vmatpush3.bf16.msra.mxu1 %v654_v5 }
   0x8   :  { %591 = vmatprep.subr.bf16.mxu1 %v655_v6 }
   0xb   :  { %592 = vmatpush3.bf16.msra.mxu1 %v655_v6 }
   0xc   :  { %593 = vmatprep.subr.bf16.mxu1 %v656_v8 }
   0xe   :  { %578 = vmatmul.mubr.msk.bf16.gmra.mrb[4].mxu1 %vm98_vm0, %v649_v4 }
   0xf   :  { %581 = vmatprep.mubr.msk.bf16.mxu1 %vm98_vm0, %v650_v7  ;;  %594 = vmatpush3.bf16.msra.mxu1 %v656_v8 }
  0x10   :  { %595 = vmatprep.subr.bf16.mxu1 %v657_v9 }
  0x13   :  { %596 = vmatpush3.bf16.msra.mxu1 %v657_v9 }
  0x14   :  { %597 = vmatprep.subr.bf16.mxu1 %v658_v12 }
  0x16   :  { %582 = vmatmul.mubr.msk.bf16.gmra.mrb[8].mxu1 %vm98_vm0, %v651_v10  ;;  %v662_v10 = vmov 0.0  }
  0x17   :  { %585 = vmatprep.mubr.msk.bf16.mxu1 %vm98_vm0, %v652_v11  ;;  %598 = vmatpush3.bf16.msra.mxu1 %v658_v12  ;;  %v664_v11 = vmov 0   ;;  %v437_v12 = vld [vmem:[%s794_s6] sm:$0x3f] }
  0x18   :  { %599 = vmatprep.subr.bf16.mxu1 %v659_v13  ;;  %621 = vmatprep.subr.bf16.mxu0 %v662_v10 }
  0x19   :  { %637 = vmatprep.mubr.msk.bf16.mxu0 %vm663_vm1, %v662_v10  ;;  %644 = vset.pattern.permute.xlu0 %v664_v11 }
  0x1a   :  { %440 = vperm.xlu0 %644, %v437_v12  }
  0x1b   :  { %600 = vmatpush3.bf16.msra.mxu1 %v659_v13  ;;  %v528_v13 = vld [vmem:[%s795_s4] ss:$0 sm:$0xff] }
  0x1c   :  { %601 = vmatprep.subr.bf16.mxu1 %v660_v15 }
  0x1e   :  { %586 = vmatmul.mubr.msk.bf16.gmra.mrb[12].mxu1 %vm98_vm0, %v653_v14 }
  0x1f   :  { %602 = vmatpush3.bf16.msra.mxu1 %v660_v15 }
  0x20   :  { %603 = vmatprep.subr.bf16.mxu1 %v661_v16 }
  0x23   :  { %604 = vmatpush3.bf16.msra.mxu1 %v661_v16 }
  0xd9   :  { %v575_v18 = vpop.f32.mrb[0].mxu1 }
  0xda   :  { %v166_v19 = vadd.f32 %v575_v18, %v510_v17  ;;  %v157_v20 = vpop.f32.mrb[1].mxu1 }
  0xdb   :  { %v158_v21 = vadd.f32 %v510_v17, %v157_v20  ;;  %v576_v22 = vpop.f32.mrb[2].mxu1 }
  0xdc   :  { %v169_v23 = vadd.f32 %v576_v22, %v510_v17  ;;  %v160_v24 = vpop.f32.mrb[3].mxu1  ;;  %v222_v26 = vmax.f32 %v166_v19, 0.0 }
  0xdd   :  { %v161_v25 = vadd.f32 %v510_v17, %v160_v24  ;;  %v220_v28 = vmax.f32 %v158_v21, 0.0 }
  0xde   :  { %v223_v27 = vmax.f32 %v169_v23, 0.0 }
  0xdf   :  { %v221_v29 = vmax.f32 %v161_v25, 0.0 }
  0xe0   :  { %v237_v30 = vpack.c.bf16 %v223_v27, %v222_v26 }
  0xe1   :  { %v236_v31 = vpack.c.bf16 %v221_v29, %v220_v28  ;;  %v579_v32 = vpop.f32.mrb[4].mxu1 }
  0xe2   :  { %v182_v33 = vadd.f32 %v579_v32, %v510_v17  ;;  %v173_v34 = vpop.f32.mrb[5].mxu1 }
  0xe3   :  { %v174_v35 = vadd.f32 %v510_v17, %v173_v34  ;;  %605 = vmatprep.mubr.bf16.mxu1 %v236_v31  ;;  %v580_v36 = vpop.f32.mrb[6].mxu1 }
  0xe4   :  { %v226_v37 = vmax.f32 %v182_v33, 0.0  ;;  %v185_v38 = vadd.f32 %v580_v36, %v510_v17  ;;  %606 = vmatmul.mubr.bf16.vlgmr.msra.gmra.mrb[16].mxu1 %v237_v30  ;;  %v176_v39 = vpop.f32.mrb[7].mxu1 }
  0xe5   :  { %v224_v40 = vmax.f32 %v174_v35, 0.0  ;;  %v177_v41 = vadd.f32 %v510_v17, %v176_v39 }
  0xe6   :  { %v227_v42 = vmax.f32 %v185_v38, 0.0 }
  0xe7   :  { %v225_v43 = vmax.f32 %v177_v41, 0.0 }
  0xe8   :  { %v239_v44 = vpack.c.bf16 %v227_v42, %v226_v37 }
  0xe9   :  { %v238_v45 = vpack.c.bf16 %v225_v43, %v224_v40  ;;  %v583_v46 = vpop.f32.mrb[8].mxu1 }
  0xea   :  { %v198_v47 = vadd.f32 %v583_v46, %v510_v17  ;;  %v189_v48 = vpop.f32.mrb[9].mxu1 }
  0xeb   :  { %609 = vmatprep.mubr.bf16.mxu1 %v238_v45  ;;  %v190_v49 = vadd.f32 %v510_v17, %v189_v48  ;;  %v584_v50 = vpop.f32.mrb[10].mxu1 }
  0xec   :  { %610 = vmatmul.mubr.bf16.gmra.mrb[20].mxu1 %v239_v44  ;;  %v230_v51 = vmax.f32 %v198_v47, 0.0  ;;  %v201_v52 = vadd.f32 %v584_v50, %v510_v17  ;;  %v192_v53 = vpop.f32.mrb[11].mxu1 }
  0xed   :  { %v228_v54 = vmax.f32 %v190_v49, 0.0  ;;  %v193_v55 = vadd.f32 %v510_v17, %v192_v53 }
  0xee   :  { %v231_v56 = vmax.f32 %v201_v52, 0.0 }
  0xef   :  { %v229_v57 = vmax.f32 %v193_v55, 0.0 }
  0xf0   :  { %v241_v58 = vpack.c.bf16 %v231_v56, %v230_v51 }
  0xf1   :  { %v240_v59 = vpack.c.bf16 %v229_v57, %v228_v54  ;;  %v587_v60 = vpop.f32.mrb[12].mxu1 }
  0xf2   :  { %v214_v61 = vadd.f32 %v587_v60, %v510_v17  ;;  %v205_v62 = vpop.f32.mrb[13].mxu1 }
  0xf3   :  { %613 = vmatprep.mubr.bf16.mxu1 %v240_v59  ;;  %v206_v63 = vadd.f32 %v510_v17, %v205_v62  ;;  %v588_v0 = vpop.f32.mrb[14].mxu1 }
  0xf4   :  { %614 = vmatmul.mubr.bf16.gmra.mrb[24].mxu1 %v241_v58  ;;  %v234_v1 = vmax.f32 %v214_v61, 0.0  ;;  %v217_v2 = vadd.f32 %v588_v0, %v510_v17  ;;  %v208_v3 = vpop.f32.mrb[15].mxu1 }
  0xf5   :  { %v232_v4 = vmax.f32 %v206_v63, 0.0  ;;  %v209_v5 = vadd.f32 %v510_v17, %v208_v3 }
  0xf6   :  { %v235_v6 = vmax.f32 %v217_v2, 0.0 }
  0xf7   :  { %v233_v7 = vmax.f32 %v209_v5, 0.0 }
  0xf8   :  { %v243_v8 = vpack.c.bf16 %v235_v6, %v234_v1  ;;  %v428_v6 = vld [vmem:[%s796_s5] sm:$0x7] }
  0xf9   :  { %v242_v9 = vpack.c.bf16 %v233_v7, %v232_v4  ;;  %v441_v7 = vpop.permute.xlu0 %440 }
  0xfb   :  { %617 = vmatprep.mubr.bf16.mxu1 %v242_v9 }
  0xfc   :  { %618 = vmatmul.mubr.bf16.gmra.mrb[28].mxu1 %v243_v8 }
 0x1b7   :  { %v607_v14 = vpop.f32.mrb[16].mxu1 }
 0x1b8   :  { %v358_v15 = vadd.f32 %v607_v14, %v528_v13  ;;  %v349_v16 = vpop.f32.mrb[17].mxu1 }
 0x1b9   :  { %v350_v17 = vadd.f32 %v528_v13, %v349_v16  ;;  %v608_v18 = vpop.f32.mrb[18].mxu1 }
 0x1ba   :  { %v361_v19 = vadd.f32 %v608_v18, %v528_v13  ;;  %v352_v20 = vpop.f32.mrb[19].mxu1  ;;  %v414_v22 = vmax.f32 %v358_v15, 0.0  ;;  %v491_v18 = vlaneseq }
 0x1bb   :  { %v353_v21 = vadd.f32 %v528_v13, %v352_v20  ;;  %v412_v24 = vmax.f32 %v350_v17, 0.0 }
 0x1bc   :  { %v415_v23 = vmax.f32 %v361_v19, 0.0  ;;  %v492_v20 = vshrl.u32 %v491_v18, 7 }
 0x1bd   :  { %v413_v25 = vmax.f32 %v353_v21, 0.0 }
 0x1be   :  { %v430_v26 = vpack.c.bf16 %v415_v23, %v414_v22 }
 0x1bf   :  { %v611_v27 = vpop.f32.mrb[20].mxu1  ;;  %v429_v28 = vpack.c.bf16 %v413_v25, %v412_v24 }
 0x1c0   :  { %v374_v29 = vadd.f32 %v611_v27, %v528_v13  ;;  %v365_v30 = vpop.f32.mrb[21].mxu1 }
 0x1c1   :  { %v366_v31 = vadd.f32 %v528_v13, %v365_v30  ;;  %622 = vmatpush3.bf16.xpose.msra.mxu0 %v429_v28  ;;  %v612_v32 = vpop.f32.mrb[22].mxu1 }
 0x1c2   :  { %v418_v33 = vmax.f32 %v374_v29, 0.0  ;;  %v377_v34 = vadd.f32 %v612_v32, %v528_v13  ;;  %v368_v35 = vpop.f32.mrb[23].mxu1  ;;  %623 = vmatprep.subr.bf16.mxu0 %v662_v10 }
 0x1c3   :  { %v416_v36 = vmax.f32 %v366_v31, 0.0  ;;  %v369_v37 = vadd.f32 %v528_v13, %v368_v35 }
 0x1c4   :  { %v419_v38 = vmax.f32 %v377_v34, 0.0 }
 0x1c5   :  { %v417_v39 = vmax.f32 %v369_v37, 0.0 }
 0x1c6   :  { %v432_v40 = vpack.c.bf16 %v419_v38, %v418_v33 }
 0x1c7   :  { %v431_v41 = vpack.c.bf16 %v417_v39, %v416_v36  ;;  %v615_v42 = vpop.f32.mrb[24].mxu1 }
 0x1c8   :  { %v390_v43 = vadd.f32 %v615_v42, %v528_v13  ;;  %v381_v44 = vpop.f32.mrb[25].mxu1 }
 0x1c9   :  { %624 = vmatpush3.bf16.xpose.msra.mxu0 %v430_v26  ;;  %v382_v45 = vadd.f32 %v528_v13, %v381_v44  ;;  %v616_v46 = vpop.f32.mrb[26].mxu1 }
 0x1ca   :  { %v422_v47 = vmax.f32 %v390_v43, 0.0  ;;  %625 = vmatprep.subr.bf16.mxu0 %v662_v10  ;;  %v393_v48 = vadd.f32 %v616_v46, %v528_v13  ;;  %v384_v49 = vpop.f32.mrb[27].mxu1 }
 0x1cb   :  { %v420_v50 = vmax.f32 %v382_v45, 0.0  ;;  %v385_v51 = vadd.f32 %v528_v13, %v384_v49 }
 0x1cc   :  { %v423_v52 = vmax.f32 %v393_v48, 0.0 }
 0x1cd   :  { %v421_v53 = vmax.f32 %v385_v51, 0.0 }
 0x1ce   :  { %v434_v54 = vpack.c.bf16 %v423_v52, %v422_v47 }
 0x1cf   :  { %v433_v55 = vpack.c.bf16 %v421_v53, %v420_v50  ;;  %v619_v56 = vpop.f32.mrb[28].mxu1 }
 0x1d0   :  { %v406_v57 = vadd.f32 %v619_v56, %v528_v13  ;;  %v397_v58 = vpop.f32.mrb[29].mxu1 }
 0x1d1   :  { %626 = vmatpush3.bf16.xpose.msra.mxu0 %v431_v41  ;;  %v398_v59 = vadd.f32 %v528_v13, %v397_v58  ;;  %v620_v60 = vpop.f32.mrb[30].mxu1 }
 0x1d2   :  { %627 = vmatprep.subr.bf16.mxu0 %v662_v10  ;;  %v426_v61 = vmax.f32 %v406_v57, 0.0  ;;  %v409_v62 = vadd.f32 %v620_v60, %v528_v13  ;;  %v400_v63 = vpop.f32.mrb[31].mxu1 }
 0x1d3   :  { %v424_v0 = vmax.f32 %v398_v59, 0.0  ;;  %v401_v1 = vadd.f32 %v528_v13, %v400_v63 }
 0x1d4   :  { %v427_v2 = vmax.f32 %v409_v62, 0.0 }
 0x1d5   :  { %v425_v3 = vmax.f32 %v401_v1, 0.0 }
 0x1d6   :  { %v436_v4 = vpack.c.bf16 %v427_v2, %v426_v61 }
 0x1d7   :  { %v435_v5 = vpack.c.bf16 %v425_v3, %v424_v0 }
 0x1d9   :  { %628 = vmatpush3.bf16.xpose.msra.mxu0 %v432_v40 }
 0x1da   :  { %629 = vmatprep.subr.bf16.mxu0 %v662_v10 }
 0x1e1   :  { %630 = vmatpush3.bf16.xpose.msra.mxu0 %v433_v55 }
 0x1e2   :  { %631 = vmatprep.subr.bf16.mxu0 %v662_v10 }
 0x1e9   :  { %632 = vmatpush3.bf16.xpose.msra.mxu0 %v434_v54 }
 0x1ea   :  { %633 = vmatprep.subr.bf16.mxu0 %v662_v10 }
 0x1f1   :  { %634 = vmatpush3.bf16.xpose.msra.mxu0 %v435_v5 }
 0x1f2   :  { %635 = vmatprep.subr.bf16.mxu0 %v662_v10 }
 0x1f9   :  { %636 = vmatpush3.bf16.xpose.msra.mxu0 %v436_v4 }
 0x200   :  { %638 = vmatmul.mubr.bf16.vlgmr.msra.gmra.mrb[0].mxu0 %v428_v6 }
 0x2d3   :  { %v477_v8 = vpop.f32.mrb[0].mxu0 }
 0x2d4   :  { %v478_v9 = vadd.f32 %v477_v8, %v441_v7  ;;  %v639_v11 = vpop.f32.mrb[1].mxu0 }
 0x2d5   :  { %v480_v12 = vpop.f32.mrb[2].mxu0 }
 0x2d6   :  { %v484_v13 = vsel %vm483_vm2, %v478_v9, -inf  ;;  %v640_v14 = vpop.f32.mrb[3].mxu0 }
 0x2d7   :  { %v485_v15 = vrot.slane %v484_v13, 4 }
 0x2d9   :  { %v486_v16 = vmax.f32 %v484_v13, %v485_v15 }
 0x2db   :  { %v487_v17 = vrot.slane %v486_v16, 2 }
 0x2dd   :  { %v488_v10 = vmax.f32 %v486_v16, %v487_v17 }
 0x2df   :  { %v489_v19 = vrot.slane %v488_v10, 1 }
 0x2e1   :  { %v490_v21 = vmax.f32 %v488_v10, %v489_v19 }
 0x2e3   :  { %vm493_vm3 = vcmp.eq.f32.partialorder %v478_v9, %v490_v21 }
 0x2e4   :  { %v494_v22 = vsel %vm493_vm3, %v492_v20, 6 }
 0x2e5   :  { %v495_v23 = vsel %vm483_vm2, %v494_v22, 2147483647 }
 0x2e6   :  { %v496_v24 = vrot.slane %v495_v23, 4 }
 0x2e8   :  { %vm497_vm4 = vcmp.lt.s32.totalorder %v495_v23, %v496_v24 }
 0x2e9   :  { %v498_v25 = vsel %vm497_vm4, %v495_v23, %v496_v24 }
 0x2ea   :  { %v499_v26 = vrot.slane %v498_v25, 2 }
 0x2ec   :  { %vm500_vm5 = vcmp.lt.s32.totalorder %v498_v25, %v499_v26 }
 0x2ed   :  { %v501_v27 = vsel %vm500_vm5, %v498_v25, %v499_v26 }
 0x2ee   :  { %v502_v28 = vrot.slane %v501_v27, 1 }
 0x2f0   :  { %vm503_vm6 = vcmp.lt.s32.totalorder %v501_v27, %v502_v28 }
 0x2f1   :  { %v504_v29 = vsel %vm503_vm6, %v501_v27, %v502_v28 }
 0x2f2   :  { %505 = vst [vmem:[%s797_s7] sm:$0x1] %v504_v29 }

</bundles_post_ra>
